<compile_context>
chip_gen: v7x
topology: tpu7x:2x2x1
jax: 0.10.0
libtpu: 0.0.40
codegen_flags: <defaults>
</compile_context>

<pallas_src>
import functools

import jax
import jax.numpy as jnp
from jax.experimental import pallas as pl
from jax.experimental.pallas import tpu as pltpu


def _round_up(x, m):
    return ((x + m - 1) // m) * m


def _disc_kernel(x_ref, w1_ref, b1_ref, w2_ref, b2_ref, w3_ref, b3_ref, out_ref):
    """Fused MLP discriminator tile: 2x (Linear + LeakyReLU) + Linear(.,1) + Sigmoid.

    x_ref:   (TB, pacdim) f32            current batch tile
    w1_ref:  (pacdim, D1p) bf16          D1p = round_up(d1, 128), zero padded
    b1_ref:  (1, D1p) f32
    w2_ref:  (D1p, D2p) bf16             D2p = round_up(d2, 128), zero padded
    b2_ref:  (1, D2p) f32
    w3_ref:  (1, D2p) f32                final weight as a zero-padded lane row
    b3_ref:  (1, 1) f32 in SMEM
    out_ref: (TB, 2): col0 = logit, col1 = sigmoid
    """
    # Layer 1: Linear -> LeakyReLU(0.2).  Dropout(0.5) is identity in eval mode.
    # bf16 MXU operands with f32 accumulation; bias/activation kept in f32.
    h = jnp.dot(x_ref[...].astype(jnp.bfloat16), w1_ref[...],
                preferred_element_type=jnp.float32) + b1_ref[...]
    h = jnp.maximum(h, 0.2 * h)

    # Layer 2: Linear -> LeakyReLU(0.2)
    h = jnp.dot(h.astype(jnp.bfloat16), w2_ref[...],
                preferred_element_type=jnp.float32) + b2_ref[...]
    h = jnp.maximum(h, 0.2 * h)

    # Final Linear(dim, 1) as a lane-reduce (keeps the N=1 GEMV off the MXU).
    logit = jnp.sum(h * w3_ref[...], axis=-1, keepdims=True) + b3_ref[0, 0]  # (TB, 1)

    # Sigmoid: exp + approx reciprocal both route to the EUP slot.
    # (Use approx=False / jax.nn.sigmoid if this ever feeds gradient-penalty math.)
    sig = pl.reciprocal(1.0 + jnp.exp(-logit), approx=True)                   # (TB, 1)

    out_ref[:, 0:1] = logit
    out_ref[:, 1:2] = sig


def init_discriminator_params(key, embedding_dim, discriminator_dim, pac=1):
    """Deterministic PyTorch-Linear-style init. Weights stored as (in, out), f32."""
    dims_in = [embedding_dim * pac] + list(discriminator_dim)
    dims_out = list(discriminator_dim) + [1]
    params = []
    for d_in, d_out in zip(dims_in, dims_out):
        key, kw, kb = jax.random.split(key, 3)
        bound = 1.0 / jnp.sqrt(jnp.float32(d_in))
        w = jax.random.uniform(kw, (d_in, d_out), jnp.float32, -bound, bound)
        b = jax.random.uniform(kb, (1, d_out), jnp.float32, -bound, bound)
        params += [w, b]
    return tuple(params)


def pack_discriminator_params(params):
    """One-time packing: zero-pad hidden dims to multiples of 128, bf16 MXU weights.

    Input:  (w1 (in,d1), b1 (1,d1), w2 (d1,d2), b2 (1,d2), w3 (d2,1), b3 (1,1))
    Output: (w1p bf16, b1p f32, w2p bf16, b2p f32, w3p f32 (1,D2p), b3p f32 (1,1))
    Zero padding is exact: padded columns stay 0 through LeakyReLU and contribute
    nothing to downstream matmuls / the final reduce.
    """
    w1, b1, w2, b2, w3, b3 = params
    d1 = w1.shape[1]
    d2 = w2.shape[1]
    d1p = _round_up(d1, 128)
    d2p = _round_up(d2, 128)
    w1p = jnp.pad(w1, ((0, 0), (0, d1p - d1))).astype(jnp.bfloat16)
    b1p = jnp.pad(b1, ((0, 0), (0, d1p - d1)))
    w2p = jnp.pad(w2, ((0, d1p - d1), (0, d2p - d2))).astype(jnp.bfloat16)
    b2p = jnp.pad(b2, ((0, 0), (0, d2p - d2)))
    w3p = jnp.pad(w3.T, ((0, 0), (0, d2p - d2)))   # (1, D2p) f32 row
    b3p = b3.reshape(1, 1)
    return w1p, b1p, w2p, b2p, w3p, b3p


@functools.partial(jax.jit, static_argnames=("pac", "return_logits", "block_rows"))
def discriminator_forward(x, packed_params, pac=1, return_logits=False,
                          block_rows=2048):
    """Mirror of Discriminator.forward (eval mode)."""
    assert x.shape[0] % pac == 0
    pacdim = x.shape[1] * pac
    xr = x.reshape(-1, pacdim)                # input_.view(-1, self.pacdim)  (glue)
    B = xr.shape[0]

    w1, b1, w2, b2, w3, b3 = packed_params
    assert w1.shape[0] == pacdim
    d1p = w1.shape[1]
    d2p = w2.shape[1]

    # Batch tile: multiple of 8 sublanes, capped at block_rows; additionally
    # capped so the grid keeps at least 2 steps whenever B allows it (so
    # dimension_semantics=("parallel",) can shard across both v7x TensorCores).
    tb = min(block_rows, _round_up(B, 8))
    tb = min(tb, max(8, _round_up(pl.cdiv(B, 2), 8)))
    tb = _round_up(tb, 8)
    bp = _round_up(B, tb)
    if bp != B:
        xr = jnp.pad(xr, ((0, bp - B), (0, 0)))   # padded rows sliced off below

    # Right-size the scoped VMEM budget from the actual footprint.
    weight_bytes = 2 * sum(int(p.size) * p.dtype.itemsize
                           for p in (w1, b1, w2, b2, w3))
    tile_bytes = 2 * tb * pacdim * 4            # x block, double buffered
    tile_bytes += 2 * tb * 128 * 4              # out block (lane-padded in VMEM)
    tile_bytes += 2 * tb * (d1p + d2p) * 4      # intermediate-activation headroom
    vmem_limit = int(min(64 << 20, max(16 << 20, 2 * (weight_bytes + tile_bytes))))

    def const_spec(arr):
        # Constant block index => fetched once, VMEM-resident across all tiles.
        return pl.BlockSpec(arr.shape, lambda i: (0, 0))

    out = pl.pallas_call(
        _disc_kernel,
        out_shape=jax.ShapeDtypeStruct((bp, 2), jnp.float32),
        grid=(bp // tb,),
        in_specs=[
            pl.BlockSpec((tb, pacdim), lambda i: (i, 0)),
            const_spec(w1), const_spec(b1),
            const_spec(w2), const_spec(b2),
            const_spec(w3),
            pl.BlockSpec(memory_space=pltpu.MemorySpace.SMEM),   # b3 scalar
        ],
        out_specs=pl.BlockSpec((tb, 2), lambda i: (i, 0)),
        compiler_params=pltpu.CompilerParams(
            dimension_semantics=("parallel",),
            vmem_limit_bytes=vmem_limit,
        ),
    )(xr, w1, b1, w2, b2, w3, b3)

    logits = out[:B, 0:1]
    sig = out[:B, 1:2]
    if return_logits:
        return sig, logits
    return sig


if __name__ == "__main__":
    # Small shapes consistent with the module: Discriminator(embedding_dim=32,
    # discriminator_dim=(64, 32), pac=1), batch=8.
    embedding_dim = 32
    discriminator_dim = (64, 32)
    pac = 1
    batch = 8

    key = jax.random.PRNGKey(0)
    key, kx = jax.random.split(key)
    x = jax.random.normal(kx, (batch, embedding_dim * pac), dtype=jnp.float32)

    raw_params = init_discriminator_params(key, embedding_dim, discriminator_dim, pac)
    packed_params = pack_discriminator_params(raw_params)

    sig, logits = discriminator_forward(x, packed_params, pac=pac, return_logits=True)
    sig = jax.block_until_ready(sig)
    logits = jax.block_until_ready(logits)

    # Sanity check against a pure-JAX f32 reference (eval-mode dropout).
    w1, b1, w2, b2, w3, b3 = raw_params
    h = x.reshape(-1, embedding_dim * pac)
    h = h @ w1 + b1
    h = jnp.where(h > 0, h, 0.2 * h)
    h = h @ w2 + b2
    h = jnp.where(h > 0, h, 0.2 * h)
    ref_logits = h @ w3 + b3
    ref_sig = jax.nn.sigmoid(ref_logits)

    assert sig.shape == (batch, 1) and logits.shape == (batch, 1)
    # bf16 MXU operands (f32 accumulate) -> tolerance loosened vs the f32 reference.
    assert jnp.allclose(logits, ref_logits, atol=5e-2, rtol=5e-2), (
        jnp.max(jnp.abs(logits - ref_logits)))
    # Sigmoid additionally uses the EUP approx reciprocal.
    assert jnp.allclose(sig, ref_sig, atol=2e-2, rtol=2e-2), (
        jnp.max(jnp.abs(sig - ref_sig)))

    # TODO(synk): Dropout(0.5) implemented as identity (eval mode); training-mode
    # stochastic dropout would need pltpu.prng_seed/prng_random_bits in-kernel.
    print("KERNEL_OK")
</pallas_src>

<mosaic_0001>
module attributes {stable_mosaic.version = 11 : i64} {
  func.func @_disc_kernel(%arg0: i32, %arg1: memref<8x32xf32, #tpu.memory_space<vmem>>, %arg2: memref<32x128xbf16, #tpu.memory_space<vmem>>, %arg3: memref<1x128xf32, #tpu.memory_space<vmem>>, %arg4: memref<128x128xbf16, #tpu.memory_space<vmem>>, %arg5: memref<1x128xf32, #tpu.memory_space<vmem>>, %arg6: memref<1x128xf32, #tpu.memory_space<vmem>>, %arg7: memref<1x1xf32, #tpu.memory_space<smem>>, %arg8: memref<8x2xf32, #tpu.memory_space<vmem>>) attributes {dimension_semantics = [#tpu.dimension_semantics<parallel>], iteration_bounds = array<i64: 1>, scalar_prefetch = 0 : i64, scratch_operands = 0 : i64, tpu.core_type = #tpu.core_type<tc>, window_params = [{transform_indices = @transform_0, window_bounds = array<i64: 8, 32>}, {pipeline_mode = #tpu.pipeline_mode<synchronous>, transform_indices = @transform_1, window_bounds = array<i64: 32, 128>}, {pipeline_mode = #tpu.pipeline_mode<synchronous>, transform_indices = @transform_2, window_bounds = array<i64: 1, 128>}, {pipeline_mode = #tpu.pipeline_mode<synchronous>, transform_indices = @transform_3, window_bounds = array<i64: 128, 128>}, {pipeline_mode = #tpu.pipeline_mode<synchronous>, transform_indices = @transform_4, window_bounds = array<i64: 1, 128>}, {pipeline_mode = #tpu.pipeline_mode<synchronous>, transform_indices = @transform_5, window_bounds = array<i64: 1, 128>}, {transform_indices = @transform_6, window_bounds = array<i64: 1, 1>}, {transform_indices = @transform_7, window_bounds = array<i64: 8, 2>}]} {
    %c0 = arith.constant 0 : index
    %c0_0 = arith.constant 0 : index
    %0 = vector.load %arg1[%c0, %c0_0] : memref<8x32xf32, #tpu.memory_space<vmem>>, vector<8x32xf32>
    %1 = arith.truncf %0 : vector<8x32xf32> to vector<8x32xbf16>
    %c0_1 = arith.constant 0 : index
    %c0_2 = arith.constant 0 : index
    %2 = vector.load %arg2[%c0_1, %c0_2] : memref<32x128xbf16, #tpu.memory_space<vmem>>, vector<32x128xbf16>
    %cst = arith.constant dense<0.000000e+00> : vector<8x128xf32>
    %3 = tpu.matmul %1, %2, %cst {dimension_numbers = #tpu.dot_dimension_numbers<[1], [0], [0], [1], [0, 0, 1, 1], [], []>} : vector<8x32xbf16>, vector<32x128xbf16>, vector<8x128xf32> -> vector<8x128xf32>
    %c0_3 = arith.constant 0 : index
    %c0_4 = arith.constant 0 : index
    %4 = vector.load %arg3[%c0_3, %c0_4] : memref<1x128xf32, #tpu.memory_space<vmem>>, vector<1x128xf32>
    %5 = vector.broadcast %4 : vector<1x128xf32> to vector<8x128xf32>
    %6 = arith.addf %3, %5 : vector<8x128xf32>
    %cst_5 = arith.constant 2.000000e-01 : f32
    %7 = vector.broadcast %cst_5 : f32 to vector<8x128xf32>
    %8 = arith.mulf %7, %6 : vector<8x128xf32>
    %9 = arith.maximumf %6, %8 : vector<8x128xf32>
    %10 = arith.truncf %9 : vector<8x128xf32> to vector<8x128xbf16>
    %c0_6 = arith.constant 0 : index
    %c0_7 = arith.constant 0 : index
    %11 = vector.load %arg4[%c0_6, %c0_7] : memref<128x128xbf16, #tpu.memory_space<vmem>>, vector<128x128xbf16>
    %cst_8 = arith.constant dense<0.000000e+00> : vector<8x128xf32>
    %12 = tpu.matmul %10, %11, %cst_8 {dimension_numbers = #tpu.dot_dimension_numbers<[1], [0], [0], [1], [0, 0, 1, 1], [], []>} : vector<8x128xbf16>, vector<128x128xbf16>, vector<8x128xf32> -> vector<8x128xf32>
    %c0_9 = arith.constant 0 : index
    %c0_10 = arith.constant 0 : index
    %13 = vector.load %arg5[%c0_9, %c0_10] : memref<1x128xf32, #tpu.memory_space<vmem>>, vector<1x128xf32>
    %14 = vector.broadcast %13 : vector<1x128xf32> to vector<8x128xf32>
    %15 = arith.addf %12, %14 : vector<8x128xf32>
    %cst_11 = arith.constant 2.000000e-01 : f32
    %16 = vector.broadcast %cst_11 : f32 to vector<8x128xf32>
    %17 = arith.mulf %16, %15 : vector<8x128xf32>
    %18 = arith.maximumf %15, %17 : vector<8x128xf32>
    %c0_12 = arith.constant 0 : index
    %c0_13 = arith.constant 0 : index
    %19 = vector.load %arg6[%c0_12, %c0_13] : memref<1x128xf32, #tpu.memory_space<vmem>>, vector<1x128xf32>
    %20 = vector.broadcast %19 : vector<1x128xf32> to vector<8x128xf32>
    %21 = arith.mulf %18, %20 : vector<8x128xf32>
    %cst_14 = arith.constant dense<0.000000e+00> : vector<8xf32>
    %22 = vector.multi_reduction <add>, %21, %cst_14 [1] : vector<8x128xf32> to vector<8xf32>
    %23 = vector.shape_cast %22 : vector<8xf32> to vector<8x1xf32>
    %c0_15 = arith.constant 0 : index
    %c0_16 = arith.constant 0 : index
    %24 = memref.load %arg7[%c0_15, %c0_16] : memref<1x1xf32, #tpu.memory_space<smem>>
    %25 = vector.broadcast %24 : f32 to vector<8x1xf32>
    %26 = arith.addf %23, %25 : vector<8x1xf32>
    %cst_17 = arith.constant 0.000000e+00 : f32
    %27 = vector.broadcast %cst_17 : f32 to vector<8x1xf32>
    %28 = arith.subf %27, %26 : vector<8x1xf32>
    %29 = math.exp %28 : vector<8x1xf32>
    %cst_18 = arith.constant 1.000000e+00 : f32
    %30 = vector.broadcast %cst_18 : f32 to vector<8x1xf32>
    %31 = arith.addf %30, %29 : vector<8x1xf32>
    %32 = tpu.reciprocal %31 {approx = true} : vector<8x1xf32> -> vector<8x1xf32>
    %c0_19 = arith.constant 0 : index
    %c0_20 = arith.constant 0 : index
    %33 = vector.load %arg8[%c0_19, %c0_20] : memref<8x2xf32, #tpu.memory_space<vmem>>, vector<8x1xf32>
    tpu.vector_store %arg8[%c0_19, %c0_20], %26 {strides = array<i32>} : memref<8x2xf32, #tpu.memory_space<vmem>>, vector<8x1xf32>,
    %c0_21 = arith.constant 0 : index
    %c1 = arith.constant 1 : index
    %34 = vector.load %arg8[%c0_21, %c1] : memref<8x2xf32, #tpu.memory_space<vmem>>, vector<8x1xf32>
    tpu.vector_store %arg8[%c0_21, %c1], %32 {strides = array<i32>} : memref<8x2xf32, #tpu.memory_space<vmem>>, vector<8x1xf32>,
    return
  }
  func.func @transform_0(%arg0: i32) -> (i32, i32) {
    %c0_i32 = arith.constant 0 : i32
    %c0_i32_0 = arith.constant 0 : i32
    return %arg0, %c0_i32 : i32, i32
  }
  func.func @transform_1(%arg0: i32) -> (i32, i32) {
    %c0_i32 = arith.constant 0 : i32
    %c0_i32_0 = arith.constant 0 : i32
    %c0_i32_1 = arith.constant 0 : i32
    return %c0_i32, %c0_i32_0 : i32, i32
  }
  func.func @transform_2(%arg0: i32) -> (i32, i32) {
    %c0_i32 = arith.constant 0 : i32
    %c0_i32_0 = arith.constant 0 : i32
    %c0_i32_1 = arith.constant 0 : i32
    return %c0_i32, %c0_i32_0 : i32, i32
  }
  func.func @transform_3(%arg0: i32) -> (i32, i32) {
    %c0_i32 = arith.constant 0 : i32
    %c0_i32_0 = arith.constant 0 : i32
    %c0_i32_1 = arith.constant 0 : i32
    return %c0_i32, %c0_i32_0 : i32, i32
  }
  func.func @transform_4(%arg0: i32) -> (i32, i32) {
    %c0_i32 = arith.constant 0 : i32
    %c0_i32_0 = arith.constant 0 : i32
    %c0_i32_1 = arith.constant 0 : i32
    return %c0_i32, %c0_i32_0 : i32, i32
  }
  func.func @transform_5(%arg0: i32) -> (i32, i32) {
    %c0_i32 = arith.constant 0 : i32
    %c0_i32_0 = arith.constant 0 : i32
    %c0_i32_1 = arith.constant 0 : i32
    return %c0_i32, %c0_i32_0 : i32, i32
  }
  func.func @transform_6(%arg0: i32) -> (i32, i32) {
    %c0_i32 = arith.constant 0 : i32
    %c0_i32_0 = arith.constant 0 : i32
    %c0_i32_1 = arith.constant 0 : i32
    return %c0_i32, %c0_i32_0 : i32, i32
  }
  func.func @transform_7(%arg0: i32) -> (i32, i32) {
    %c0_i32 = arith.constant 0 : i32
    %c0_i32_0 = arith.constant 0 : i32
    return %arg0, %c0_i32 : i32, i32
  }
}

</mosaic_0001>

<bundles_post_ra>
// kernel: discriminator_forward.1
= control target key start
LH: loop header
LB: loop body
LE: loop exit
PB: predicated region body
PF: predicated region fallthrough
CT: control target
= control target key end

     0   :  { %13 = vsyncpa [#allocation4], 0  ;;  %s532_s0 = inlined_call_operand.hbm [shape: f32[8,32], index: 0, kind: input, shape index: {}]   ;;  %s533_s1 = inlined_call_operand.hbm [shape: bf16[32,128], index: 1, kind: input, shape index: {}]   ;;  %s534_s2 = inlined_call_operand.vmem [shape: f32[1,128], index: 2, kind: input, shape index: {}]   ;;  %s535_s3 = inlined_call_operand.hbm [shape: bf16[128,128], index: 3, kind: input, shape index: {}]   ;;  %s536_s4 = inlined_call_operand.vmem [shape: f32[1,128], index: 4, kind: input, shape index: {}]   ;;  %s537_s5 = inlined_call_operand.vmem [shape: f32[1,128], index: 5, kind: input, shape index: {}]   ;;  %s538_s6 = inlined_call_operand.<no memory space> [shape: f32[1,1], index: 6, kind: input, shape index: {}]   ;;  %s539_s7 = inlined_call_operand.vmem [shape: f32[8,2], index: 7, kind: output, shape index: {}]  }
   0x1   :  { %14 = vsyncpa [#allocation6], 0  ;;  %s425_s24 = smov [#allocation5]   ;;  %s355_s28 = scalar_lea.hbm %s533_s1, 256 }
   0x2   :  { %s30_s25 = sshll.u32 %s425_s24, 4  ;;  %p356_p0 = scmp.ne.s32.totalorder %s533_s1, %s355_s28  ;;  %s31_s25 = int_to_ptr.vmem [resolvable:$true] %s30_s25 }
   0x3   :  { %p359_p1 = scmp.lt.u32.totalorder %s355_s28, %s533_s1 }
   0x5   :  { %p361_p2 = pnand %p359_p1, %p356_p0 }
   0x7   :  { %364 = shalt.err (!%p361_p2)
}
   0x8   :  { %s365_s10 = scalar_lea.vmem %s31_s25, 256  ;;  %p370_p4 = scmp.lt.s32.totalorder %s31_s25, %s31_s25 }
   0x9   :  { %p366_p3 = scmp.ne.s32.totalorder %s31_s25, %s365_s10  ;;  %p371_p5 = scmp.lt.s32.totalorder %s365_s10, %s365_s10 }
   0xb   :  { %p372_p6 = por %p371_p5, %p370_p4 }
   0xd   :  { %p373_p7 = pnand %p372_p6, %p366_p3 }
   0xf   :  { %376 = shalt.err (!%p373_p7)
}
  0x10   :  { %s426_s11 = smov 64   ;;  %s427_s12 = smov 4  }
  0x11   :  { %36 = dma.hbm_to_vmem [thread:$0]  %s533_s1, 256, %s31_s25, [#allocation6], %s426_s11, %s426_s11, %s427_s12  }
  0x12   :  { %s428_s15 = smov [#allocation3]   ;;  %s429_s17 = smov [#allocation7]  }
  0x13   :  { %s21_s16 = sshll.u32 %s428_s15, 4  ;;  %s44_s18 = sshll.u32 %s429_s17, 4  ;;  %s22_s16 = int_to_ptr.vmem [resolvable:$true] %s21_s16  ;;  %s45_s18 = int_to_ptr.vmem [resolvable:$true] %s44_s18 }
  0x14   :  { %s377_s21 = scalar_lea.hbm %s532_s0, 128 }
  0x15   :  { %p378_p8 = scmp.ne.s32.totalorder %s532_s0, %s377_s21  ;;  %p381_p9 = scmp.lt.u32.totalorder %s377_s21, %s532_s0 }
  0x17   :  { %p383_p10 = pnand %p381_p9, %p378_p8 }
  0x19   :  { %386 = shalt.err (!%p383_p10)
}
  0x1a   :  { %s387_s1 = scalar_lea.vmem %s22_s16, 128  ;;  %p392_p12 = scmp.lt.s32.totalorder %s22_s16, %s22_s16 }
  0x1b   :  { %p388_p11 = scmp.ne.s32.totalorder %s22_s16, %s387_s1  ;;  %p393_p13 = scmp.lt.s32.totalorder %s387_s1, %s387_s1 }
  0x1d   :  { %p394_p0 = por %p393_p13, %p392_p12 }
  0x1f   :  { %p395_p1 = pnand %p394_p0, %p388_p11 }
  0x21   :  { %398 = shalt.err (!%p395_p1)
}
  0x22   :  { %24 = dma.hbm_to_vmem [thread:$0]  %s532_s0, 128, %s22_s16, [#allocation4]  }
  0x23   :  { %s399_s30 = scalar_lea.hbm %s535_s3, 1024 }
  0x24   :  { %p400_p2 = scmp.ne.s32.totalorder %s535_s3, %s399_s30  ;;  %p403_p3 = scmp.lt.u32.totalorder %s399_s30, %s535_s3 }
  0x26   :  { %p405_p4 = pnand %p403_p3, %p400_p2 }
  0x28   :  { %408 = shalt.err (!%p405_p4)
}
  0x29   :  { %s409_s14 = scalar_lea.vmem %s45_s18, 1024  ;;  %p414_p6 = scmp.lt.s32.totalorder %s45_s18, %s45_s18 }
  0x2a   :  { %p410_p5 = scmp.ne.s32.totalorder %s45_s18, %s409_s14  ;;  %p415_p7 = scmp.lt.s32.totalorder %s409_s14, %s409_s14 }
  0x2c   :  { %p416_p8 = por %p415_p7, %p414_p6 }
  0x2e   :  { %p417_p9 = pnand %p416_p8, %p410_p5 }
  0x30   :  { %420 = shalt.err (!%p417_p9)
}
  0x31   :  { %50 = dma.hbm_to_vmem [thread:$0]  %s535_s3, 1024, %s45_s18, [#allocation6], %s426_s11, %s426_s11, %s427_s12  }
  0x32   :  { %421 = dma.done.wait [#allocation4], 128  }
  0x33   :  { %422 = vsyncadd [#allocation4], 4294967168 }
  0x34   :  { %423 = dma.done.wait [#allocation6], 1280  }
  0x35   :  { %424 = vsyncadd [#allocation6], 4294966016  ;;  %v430_v0 = vmov 0.0   ;;  %vm431_vm0 = vmmov 0   ;;  %v341_v1 = vld [vmem:[#allocation5] sm:$0xff]   ;;  %v342_v2 = vld [vmem:[#allocation5 + $0x8] sm:$0xff]   ;;  %v263_v32 = vstv %s538_s6 }
  0x36   :  { %306 = vmatprep.subr.bf16.mxu0 %v430_v0  ;;  %310 = vmatprep.mubr.msk.bf16.mxu0 %vm431_vm0, %v430_v0  ;;  %v67_v3 = vld [vmem:[#allocation3] sm:$0xff]  ;;  %v343_v4 = vld [vmem:[#allocation7] sm:$0xff]   ;;  %vm92_vm1 = vcmask 261120   ;;  %v345_v7 = vld [vmem:[#allocation7 + $0x10] sm:$0xff]   ;;  %vm270_vm2 = vcmask 7168   ;;  %vm272_vm3 = vcmask 15368  }
  0x37   :  { %314 = vmatprep.subr.bf16.mxu1 %v430_v0  ;;  %330 = vmatprep.mubr.msk.bf16.mxu1 %vm431_vm0, %v430_v0  ;;  %v68_v5 = vpack.c.bf16 %v67_v3, %v67_v3  ;;  %v344_v6 = vld [vmem:[#allocation7 + $0x8] sm:$0xff]   ;;  %v346_v8 = vld [vmem:[#allocation7 + $0x18] sm:$0xff]   ;;  %v347_v9 = vld [vmem:[#allocation7 + $0x20] sm:$0xff]  }
  0x38   :  { %307 = vmatpush3.bf16.msra.mxu0 %v341_v1  ;;  %315 = vmatpush3.bf16.msra.mxu1 %v343_v4  ;;  %v348_v10 = vld [vmem:[#allocation7 + $0x28] sm:$0xff]   ;;  %v349_v11 = vld [vmem:[#allocation7 + $0x30] sm:$0xff]   ;;  %v350_v12 = vld [vmem:[#allocation7 + $0x38] sm:$0xff]  }
  0x39   :  { %308 = vmatprep.subr.bf16.mxu0 %v430_v0  ;;  %316 = vmatprep.subr.bf16.mxu1 %v430_v0  ;;  %v280_v13 = vld [vmem:[%s534_s2] ss:$0 sm:$0xff] }
  0x3a   :  { %v284_v22 = vld [vmem:[%s536_s4] ss:$0 sm:$0xff] }
  0x3b   :  { %v293_v29 = vld [vmem:[%s537_s5] ss:$0 sm:$0xff] }
  0x3c   :  { %309 = vmatpush3.bf16.msra.mxu0 %v342_v2  ;;  %317 = vmatpush3.bf16.msra.mxu1 %v344_v6 }
  0x3d   :  { %318 = vmatprep.subr.bf16.mxu1 %v430_v0 }
  0x3f   :  { %311 = vmatmul.mubr.msk.bf16.vlgmr.msra.gmra.mrb[0].mxu0 %vm92_vm1, %v68_v5 }
  0x40   :  { %319 = vmatpush3.bf16.msra.mxu1 %v345_v7 }
  0x41   :  { %320 = vmatprep.subr.bf16.mxu1 %v430_v0 }
  0x44   :  { %321 = vmatpush3.bf16.msra.mxu1 %v346_v8 }
  0x45   :  { %322 = vmatprep.subr.bf16.mxu1 %v430_v0 }
  0x48   :  { %323 = vmatpush3.bf16.msra.mxu1 %v347_v9 }
  0x49   :  { %324 = vmatprep.subr.bf16.mxu1 %v430_v0 }
  0x4c   :  { %325 = vmatpush3.bf16.msra.mxu1 %v348_v10 }
  0x4d   :  { %326 = vmatprep.subr.bf16.mxu1 %v430_v0 }
  0x50   :  { %327 = vmatpush3.bf16.msra.mxu1 %v349_v11 }
  0x51   :  { %328 = vmatprep.subr.bf16.mxu1 %v430_v0 }
  0x54   :  { %329 = vmatpush3.bf16.msra.mxu1 %v350_v12 }
 0x112   :  { %v130_v14 = vpop.f32.mrb[0].mxu0 }
 0x113   :  { %v131_v15 = vadd.f32 %v280_v13, %v130_v14  ;;  %v312_v16 = vpop.f32.mrb[1].mxu0 }
 0x114   :  { %v133_v17 = vpop.f32.mrb[2].mxu0 }
 0x115   :  { %v136_v18 = vmul.f32 0.2, %v131_v15  ;;  %v313_v19 = vpop.f32.mrb[3].mxu0 }
 0x117   :  { %v137_v20 = vmax.f32 %v131_v15, %v136_v18 }
 0x119   :  { %v138_v21 = vpack.c.bf16 %v137_v20, %v137_v20 }
 0x11b   :  { %331 = vmatmul.mubr.bf16.vlgmr.msra.gmra.mrb[0].mxu1 %v138_v21 }
 0x1ee   :  { %v244_v23 = vpop.f32.mrb[0].mxu1 }
 0x1ef   :  { %v245_v24 = vadd.f32 %v284_v22, %v244_v23  ;;  %v332_v25 = vpop.f32.mrb[1].mxu1 }
 0x1f0   :  { %v247_v26 = vpop.f32.mrb[2].mxu1 }
 0x1f1   :  { %v250_v27 = vmul.f32 0.2, %v245_v24  ;;  %v333_v28 = vpop.f32.mrb[3].mxu1 }
 0x1f3   :  { %v251_v30 = vmax.f32 %v245_v24, %v250_v27 }
 0x1f5   :  { %v259_v31 = vmul.f32 %v293_v29, %v251_v30 }
 0x1f7   :  { %260 = vadd.xlane.f32.xlu0 %v259_v31 }
 0x284   :  { %v261_v33 = vpop.xlane.xlu0 %260 }
 0x285   :  { %v264_v34 = vadd.f32 %v263_v32, %v261_v33 }
 0x287   :  { %v265_v35 = vsub.f32 0.0, %v264_v34  ;;  %271 = vst.msk [vmem:[%s539_s7] sm:$0xff] %vm270_vm2, %v264_v34 }
 0x289   :  { %v266_v36 = vmul.f32 1.442695, %v265_v35 }
 0x28b   :  { %351 = vpow2.f32 %v266_v36 }
 0x295   :  { %v352_v37 = vpop.eup %351 }
 0x296   :  { %v268_v38 = vadd.f32 1.0, %v352_v37 }
 0x298   :  { %353 = vrcp.f32 %v268_v38 }
 0x2a2   :  { %v354_v39 = vpop.eup %353 }
 0x2a3   :  { %273 = vst.msk [vmem:[%s539_s7] sm:$0xff] %vm272_vm3, %v354_v39 }
 0x2a4   :  { %278 = vsyncpa [#allocation4], 1 }
 0x2a5   :  { %279 = vsyncpa [#allocation6], 1 }

</bundles_post_ra>
